<compile_context>
chip_gen: v6e
topology: v6e:2x2x1
jax: 0.10.0
libtpu: 0.0.40
codegen_flags: <defaults>
</compile_context>

<pallas_src>
import jax
import jax.numpy as jnp
from jax import lax
from jax.experimental import pallas as pl
from jax.experimental.pallas import tpu as pltpu

TEMPERATURE = 50.0
SQRT_INV_T = float(1.0 / (TEMPERATURE ** 0.5))   # folded into Stage-1 output
EPS = 1e-12  # matches F.normalize default eps


def _round_up(x, m):
    return (x + m - 1) // m * m


def _pick_tiles(n_pad):
    # Row tile: 256 when it divides (v5e may prefer 128; 256 is a good default
    # on v6e/v7x).  Column tile: as large and lane-dense as divides, to
    # amortize the ~0.35us/step grid cost and keep stores unmasked.
    tm = 256 if n_pad % 256 == 0 else 128
    tn = 128
    for t in (1024, 512, 256):
        if n_pad % t == 0:
            tn = t
            break
    return tm, tn


# ----------------------------------------------------------------------------
# Stage 1: row-wise L2 normalization, scaled by sqrt(1/T), emitted as bf16.
# ----------------------------------------------------------------------------
def _normalize_kernel(x_ref, o_ref):
    x = x_ref[...].astype(jnp.float32)                       # (T, D)
    sq = jnp.sum(x * x, axis=-1, keepdims=True)              # (T, 1)
    # 1 / max(||x||, eps) == rsqrt(max(||x||^2, eps^2)); rsqrt runs on the EUP.
    inv = lax.rsqrt(jnp.maximum(sq, EPS * EPS)) * SQRT_INV_T
    o_ref[...] = (x * inv).astype(o_ref.dtype)


def _normalize(x):
    n_pad, d = x.shape
    t = 256 if n_pad % 256 == 0 else 128
    return pl.pallas_call(
        _normalize_kernel,
        out_shape=jax.ShapeDtypeStruct((n_pad, d), jnp.bfloat16),
        grid=(n_pad // t,),
        in_specs=[pl.BlockSpec((t, d), lambda i: (i, 0))],
        out_specs=pl.BlockSpec((t, d), lambda i: (i, 0)),
        compiler_params=pltpu.CompilerParams(dimension_semantics=("parallel",)),
    )(x)


# ----------------------------------------------------------------------------
# Stage 2: tiled (N_pad, N_pad) similarity + masked row reductions.
# Per-row partial sums accumulate into output blocks indexed only by i, so the
# i axis is independent ("parallel") and the j axis is the reduction
# ("arbitrary") with init at j == 0.
# ----------------------------------------------------------------------------
def _snnl_tile_kernel(lab_rows_ref, lab_cols_ref, lhs_ref, rhs_ref,
                      out_all_ref, out_pos_ref):
    j = pl.program_id(1)

    lhs = lhs_ref[...]                                       # (TM, D) bf16 (already * sqrt(1/T))
    rhs = rhs_ref[...]                                       # (TN, D) bf16
    sim = lax.dot_general(
        lhs, rhs,
        dimension_numbers=(((1,), (1,)), ((), ())),
        preferred_element_type=jnp.float32,
    )                                                        # (TM, TN) f32, temperature pre-folded
    e = jnp.exp(sim)

    # Same-label mask; the diagonal is removed analytically below (no NxN iota).
    pos = lab_rows_ref[...] == lab_cols_ref[...]             # (TM,1)==(1,TN) -> (TM,TN)

    row_all = jnp.sum(e, axis=-1, keepdims=True)                        # (TM, 1)
    row_same = jnp.sum(jnp.where(pos, e, 0.0), axis=-1, keepdims=True)  # (TM, 1)

    @pl.when(j == 0)
    def _init():
        # exp(sim_ii) per row from the same bf16 values the MXU consumes.
        # labels[i] == labels[i] always, so this was folded into row_same
        # somewhere along the j axis and must be removed once per row.
        lf = lhs.astype(jnp.float32)
        diag = jnp.exp(jnp.sum(lf * lf, axis=-1, keepdims=True))        # (TM, 1)
        out_all_ref[...] = row_all
        out_pos_ref[...] = row_same - diag

    @pl.when(j > 0)
    def _acc():
        out_all_ref[...] += row_all
        out_pos_ref[...] += row_same


@jax.jit
def base_snn_loss(reps, labels):
    """reps: (N, D) float array, labels: (N,) int array -> scalar f32 loss."""
    n, d = reps.shape
    lab = labels.astype(jnp.int32)

    # Positive-pair count via O(N log N) class histogram (no NxN compare).
    # TODO(synk): cnt_pos == 0 (no positive pairs) yields NaN, matching
    # torch.mean over an empty selection.
    _, inv = jnp.unique(lab, size=n, return_inverse=True)
    counts = jnp.zeros((n,), jnp.float32).at[inv.ravel()].add(1.0)
    cnt_pos = jnp.sum(counts * counts) - float(n)

    # Pad N up to a tile-aligned size with zero rows and distinct row/col
    # sentinel labels.  Zero rows stay exactly zero after normalization, so
    # every padded similarity is exp(0) = 1 -> exact constant corrections.
    n_pad = _round_up(n, 128)
    p = n_pad - n
    tm, tn = _pick_tiles(n_pad)

    sent_row = jnp.min(lab) - 1   # sentinel for padded rows
    sent_col = jnp.min(lab) - 2   # different sentinel for padded cols
    reps_p = jnp.concatenate([reps, jnp.zeros((p, d), reps.dtype)], axis=0)
    lab_rows = jnp.concatenate(
        [lab, jnp.broadcast_to(sent_row, (p,))]).reshape(n_pad, 1)
    lab_cols = jnp.concatenate(
        [lab, jnp.broadcast_to(sent_col, (p,))]).reshape(1, n_pad)

    reps_n = _normalize(reps_p)                              # (N_pad, D) bf16

    grid = (n_pad // tm, n_pad // tn)
    out_all, out_pos = pl.pallas_call(
        _snnl_tile_kernel,
        out_shape=(jax.ShapeDtypeStruct((n_pad, 1), jnp.float32),
                   jax.ShapeDtypeStruct((n_pad, 1), jnp.float32)),
        grid=grid,
        in_specs=[
            pl.BlockSpec((tm, 1), lambda i, j: (i, 0)),      # labels of tile rows
            pl.BlockSpec((1, tn), lambda i, j: (0, j)),      # labels of tile cols
            pl.BlockSpec((tm, d), lambda i, j: (i, 0)),      # lhs row block
            pl.BlockSpec((tn, d), lambda i, j: (j, 0)),      # rhs row block
        ],
        out_specs=(pl.BlockSpec((tm, 1), lambda i, j: (i, 0)),
                   pl.BlockSpec((tm, 1), lambda i, j: (i, 0))),
        compiler_params=pltpu.CompilerParams(
            dimension_semantics=("parallel", "arbitrary")),
    )(lab_rows, lab_cols, reps_n, reps_n)

    # Remove the exact padded contributions (exp(0) = 1 each):
    #   all-pairs excess  = n_pad^2 - n^2
    #   diag over-subtraction for padded rows = p
    sum_all = jnp.sum(out_all) - float(n_pad * n_pad - n * n)
    sum_pos = jnp.sum(out_pos) + float(p)
    pexp = sum_pos / cnt_pos                                 # mean over positive pairs
    return -jnp.log(pexp / sum_all)


def _reference(reps, labels):
    """Pure-JAX f32 reference mirroring the PyTorch forward."""
    reps = reps.astype(jnp.float32)
    norm = jnp.maximum(jnp.linalg.norm(reps, axis=1, keepdims=True), EPS)
    reps_n = reps / norm
    sim = (reps_n @ reps_n.T) / TEMPERATURE
    pos = labels[:, None] == labels[None, :]
    pos = pos & ~jnp.eye(labels.shape[0], dtype=bool)
    e = jnp.exp(sim)
    pexp = jnp.sum(jnp.where(pos, e, 0.0)) / jnp.sum(pos)
    texp = jnp.sum(e)
    return -jnp.log(pexp / texp)


if __name__ == "__main__":
    key = jax.random.PRNGKey(0)
    # (N, D, num_classes) cases:
    #  - 384x128: no padding, tm=tn=128 -> 3x3 grid (exercises j-accumulation
    #    and the parallel i axis).
    #  - 8x32: tiny, padded to 128, single tile.
    #  - 200x64: padded to 256, tm=tn=256, single tile with mixed real/pad rows.
    #  - 520x128: padded to 640, 5x5 grid, padding spans a partial row block.
    cases = [(384, 128, 4), (8, 32, 3), (200, 64, 6), (520, 128, 5)]
    for idx, (n, dim, ncls) in enumerate(cases):
        k1, k2, key = jax.random.split(key, 3)
        reps = jax.random.normal(k1, (n, dim), dtype=jnp.float32)
        labels = jax.random.randint(k2, (n,), 0, ncls, dtype=jnp.int32)
        loss = jax.block_until_ready(base_snn_loss(reps, labels))
        ref = _reference(reps, labels)
        assert jnp.allclose(loss, ref, rtol=2e-3, atol=2e-3), (idx, loss, ref)
    print("KERNEL_OK")
</pallas_src>

<mosaic_0001>
module attributes {stable_mosaic.version = 11 : i64} {
  func.func private @main(%arg0: i32) attributes {dimension_semantics = [#tpu.dimension_semantics<core_parallel>], iteration_bounds = array<i64: 2>, tpu.core_type = #tpu.core_type<sc_scalar_subcore>, window_params = []} {
    return
  }
}

module attributes {stable_mosaic.version = 11 : i64} {
  func.func private @main(%arg0: i32) attributes {dimension_semantics = [#tpu.dimension_semantics<core_parallel>], iteration_bounds = array<i64: 2>, tpu.core_type = #tpu.core_type<sc_scalar_subcore>, window_params = []} {
    return
  }
}

module attributes {stable_mosaic.version = 11 : i64} {
  func.func @_normalize_kernel(%arg0: i32, %arg1: memref<128x128xf32, #tpu.memory_space<vmem>>, %arg2: memref<128x128xbf16, #tpu.memory_space<vmem>>) attributes {dimension_semantics = [#tpu.dimension_semantics<parallel>], iteration_bounds = array<i64: 3>, scalar_prefetch = 0 : i64, scratch_operands = 0 : i64, tpu.core_type = #tpu.core_type<tc>, window_params = [{transform_indices = @transform_0, window_bounds = array<i64: 128, 128>}, {transform_indices = @transform_1, window_bounds = array<i64: 128, 128>}]} {
    %c0 = arith.constant 0 : index
    %c0_0 = arith.constant 0 : index
    %0 = vector.load %arg1[%c0, %c0_0] : memref<128x128xf32, #tpu.memory_space<vmem>>, vector<128x128xf32>
    %1 = arith.mulf %0, %0 : vector<128x128xf32>
    %cst = arith.constant dense<0.000000e+00> : vector<128xf32>
    %2 = vector.multi_reduction <add>, %1, %cst [1] : vector<128x128xf32> to vector<128xf32>
    %3 = vector.shape_cast %2 : vector<128xf32> to vector<128x1xf32>
    %cst_1 = arith.constant 1.000000e-24 : f32
    %4 = vector.broadcast %cst_1 : f32 to vector<128x1xf32>
    %5 = arith.maximumf %3, %4 : vector<128x1xf32>
    %6 = math.rsqrt %5 : vector<128x1xf32>
    %cst_2 = arith.constant 0.141421363 : f32
    %7 = vector.broadcast %cst_2 : f32 to vector<128x1xf32>
    %8 = arith.mulf %6, %7 : vector<128x1xf32>
    %9 = vector.broadcast %8 : vector<128x1xf32> to vector<128x128xf32>
    %10 = arith.mulf %0, %9 : vector<128x128xf32>
    %11 = arith.truncf %10 : vector<128x128xf32> to vector<128x128xbf16>
    %c0_3 = arith.constant 0 : index
    %c0_4 = arith.constant 0 : index
    %12 = vector.load %arg2[%c0_3, %c0_4] : memref<128x128xbf16, #tpu.memory_space<vmem>>, vector<128x128xbf16>
    tpu.vector_store %arg2[%c0_3, %c0_4], %11 {strides = array<i32>} : memref<128x128xbf16, #tpu.memory_space<vmem>>, vector<128x128xbf16>,
    return
  }
  func.func @transform_0(%arg0: i32) -> (i32, i32) {
    %c0_i32 = arith.constant 0 : i32
    %c0_i32_0 = arith.constant 0 : i32
    return %arg0, %c0_i32 : i32, i32
  }
  func.func @transform_1(%arg0: i32) -> (i32, i32) {
    %c0_i32 = arith.constant 0 : i32
    %c0_i32_0 = arith.constant 0 : i32
    return %arg0, %c0_i32 : i32, i32
  }
}

module attributes {stable_mosaic.version = 11 : i64} {
  func.func @_snnl_tile_kernel(%arg0: i32, %arg1: i32, %arg2: memref<128x1xi32, #tpu.memory_space<vmem>>, %arg3: memref<1x128xi32, #tpu.memory_space<vmem>>, %arg4: memref<128x128xbf16, #tpu.memory_space<vmem>>, %arg5: memref<128x128xbf16, #tpu.memory_space<vmem>>, %arg6: memref<128x1xf32, #tpu.memory_space<vmem>>, %arg7: memref<128x1xf32, #tpu.memory_space<vmem>>) attributes {dimension_semantics = [#tpu.dimension_semantics<parallel>, #tpu.dimension_semantics<arbitrary>], iteration_bounds = array<i64: 3, 3>, scalar_prefetch = 0 : i64, scratch_operands = 0 : i64, tpu.core_type = #tpu.core_type<tc>, window_params = [{transform_indices = @transform_0, window_bounds = array<i64: 128, 1>}, {transform_indices = @transform_1, window_bounds = array<i64: 1, 128>}, {transform_indices = @transform_2, window_bounds = array<i64: 128, 128>}, {transform_indices = @transform_3, window_bounds = array<i64: 128, 128>}, {transform_indices = @transform_4, window_bounds = array<i64: 128, 1>}, {transform_indices = @transform_5, window_bounds = array<i64: 128, 1>}]} {
    %c0 = arith.constant 0 : index
    %c0_0 = arith.constant 0 : index
    %0 = vector.load %arg4[%c0, %c0_0] : memref<128x128xbf16, #tpu.memory_space<vmem>>, vector<128x128xbf16>
    %c0_1 = arith.constant 0 : index
    %c0_2 = arith.constant 0 : index
    %1 = vector.load %arg5[%c0_1, %c0_2] : memref<128x128xbf16, #tpu.memory_space<vmem>>, vector<128x128xbf16>
    %cst = arith.constant dense<0.000000e+00> : vector<128x128xf32>
    %2 = tpu.matmul %0, %1, %cst {dimension_numbers = #tpu.dot_dimension_numbers<[1], [1], [0], [0], [0, 0, 1, 0], [], []>} : vector<128x128xbf16>, vector<128x128xbf16>, vector<128x128xf32> -> vector<128x128xf32>
    %3 = math.exp %2 : vector<128x128xf32>
    %c0_3 = arith.constant 0 : index
    %c0_4 = arith.constant 0 : index
    %4 = vector.load %arg2[%c0_3, %c0_4] : memref<128x1xi32, #tpu.memory_space<vmem>>, vector<128x1xi32>
    %c0_5 = arith.constant 0 : index
    %c0_6 = arith.constant 0 : index
    %5 = vector.load %arg3[%c0_5, %c0_6] : memref<1x128xi32, #tpu.memory_space<vmem>>, vector<1x128xi32>
    %6 = vector.broadcast %4 : vector<128x1xi32> to vector<128x128xi32>
    %7 = vector.broadcast %5 : vector<1x128xi32> to vector<128x128xi32>
    %8 = arith.cmpi eq, %6, %7 : vector<128x128xi32>
    %cst_7 = arith.constant dense<0.000000e+00> : vector<128xf32>
    %9 = vector.multi_reduction <add>, %3, %cst_7 [1] : vector<128x128xf32> to vector<128xf32>
    %10 = vector.shape_cast %9 : vector<128xf32> to vector<128x1xf32>
    %cst_8 = arith.constant 0.000000e+00 : f32
    %11 = vector.broadcast %cst_8 : f32 to vector<128x128xf32>
    %12 = arith.select %8, %3, %11 : vector<128x128xi1>, vector<128x128xf32>
    %cst_9 = arith.constant dense<0.000000e+00> : vector<128xf32>
    %13 = vector.multi_reduction <add>, %12, %cst_9 [1] : vector<128x128xf32> to vector<128xf32>
    %14 = vector.shape_cast %13 : vector<128xf32> to vector<128x1xf32>
    %c0_i32 = arith.constant 0 : i32
    %15 = arith.cmpi eq, %arg1, %c0_i32 : i32
    %16 = arith.extui %15 : i1 to i32
    %c0_i32_10 = arith.constant 0 : i32
    %17 = arith.cmpi ne, %16, %c0_i32_10 : i32
    scf.if %17 {
      %21 = arith.extf %0 : vector<128x128xbf16> to vector<128x128xf32>
      %22 = arith.mulf %21, %21 : vector<128x128xf32>
      %cst_13 = arith.constant dense<0.000000e+00> : vector<128xf32>
      %23 = vector.multi_reduction <add>, %22, %cst_13 [1] : vector<128x128xf32> to vector<128xf32>
      %24 = vector.shape_cast %23 : vector<128xf32> to vector<128x1xf32>
      %25 = math.exp %24 : vector<128x1xf32>
      %c0_14 = arith.constant 0 : index
      %c0_15 = arith.constant 0 : index
      %26 = vector.load %arg6[%c0_14, %c0_15] : memref<128x1xf32, #tpu.memory_space<vmem>>, vector<128x1xf32>
      tpu.vector_store %arg6[%c0_14, %c0_15], %10 {strides = array<i32>} : memref<128x1xf32, #tpu.memory_space<vmem>>, vector<128x1xf32>,
      %27 = arith.subf %14, %25 : vector<128x1xf32>
      %c0_16 = arith.constant 0 : index
      %c0_17 = arith.constant 0 : index
      %28 = vector.load %arg7[%c0_16, %c0_17] : memref<128x1xf32, #tpu.memory_space<vmem>>, vector<128x1xf32>
      tpu.vector_store %arg7[%c0_16, %c0_17], %27 {strides = array<i32>} : memref<128x1xf32, #tpu.memory_space<vmem>>, vector<128x1xf32>,
    } else {
    }
    %c0_i32_11 = arith.constant 0 : i32
    %18 = arith.cmpi sgt, %arg1, %c0_i32_11 : i32
    %19 = arith.extui %18 : i1 to i32
    %c0_i32_12 = arith.constant 0 : i32
    %20 = arith.cmpi ne, %19, %c0_i32_12 : i32
    scf.if %20 {
      %c0_13 = arith.constant 0 : index
      %c0_14 = arith.constant 0 : index
      %21 = vector.load %arg6[%c0_13, %c0_14] : memref<128x1xf32, #tpu.memory_space<vmem>>, vector<128x1xf32>
      %22 = arith.addf %21, %10 : vector<128x1xf32>
      %c0_15 = arith.constant 0 : index
      %c0_16 = arith.constant 0 : index
      %23 = vector.load %arg6[%c0_15, %c0_16] : memref<128x1xf32, #tpu.memory_space<vmem>>, vector<128x1xf32>
      tpu.vector_store %arg6[%c0_15, %c0_16], %22 {strides = array<i32>} : memref<128x1xf32, #tpu.memory_space<vmem>>, vector<128x1xf32>,
      %c0_17 = arith.constant 0 : index
      %c0_18 = arith.constant 0 : index
      %24 = vector.load %arg7[%c0_17, %c0_18] : memref<128x1xf32, #tpu.memory_space<vmem>>, vector<128x1xf32>
      %25 = arith.addf %24, %14 : vector<128x1xf32>
      %c0_19 = arith.constant 0 : index
      %c0_20 = arith.constant 0 : index
      %26 = vector.load %arg7[%c0_19, %c0_20] : memref<128x1xf32, #tpu.memory_space<vmem>>, vector<128x1xf32>
      tpu.vector_store %arg7[%c0_19, %c0_20], %25 {strides = array<i32>} : memref<128x1xf32, #tpu.memory_space<vmem>>, vector<128x1xf32>,
    } else {
    }
    return
  }
  func.func @transform_0(%arg0: i32, %arg1: i32) -> (i32, i32) {
    %c0_i32 = arith.constant 0 : i32
    %c0_i32_0 = arith.constant 0 : i32
    return %arg0, %c0_i32 : i32, i32
  }
  func.func @transform_1(%arg0: i32, %arg1: i32) -> (i32, i32) {
    %c0_i32 = arith.constant 0 : i32
    %c0_i32_0 = arith.constant 0 : i32
    return %c0_i32, %arg1 : i32, i32
  }
  func.func @transform_2(%arg0: i32, %arg1: i32) -> (i32, i32) {
    %c0_i32 = arith.constant 0 : i32
    %c0_i32_0 = arith.constant 0 : i32
    return %arg0, %c0_i32 : i32, i32
  }
  func.func @transform_3(%arg0: i32, %arg1: i32) -> (i32, i32) {
    %c0_i32 = arith.constant 0 : i32
    %c0_i32_0 = arith.constant 0 : i32
    return %arg1, %c0_i32 : i32, i32
  }
  func.func @transform_4(%arg0: i32, %arg1: i32) -> (i32, i32) {
    %c0_i32 = arith.constant 0 : i32
    %c0_i32_0 = arith.constant 0 : i32
    return %arg0, %c0_i32 : i32, i32
  }
  func.func @transform_5(%arg0: i32, %arg1: i32) -> (i32, i32) {
    %c0_i32 = arith.constant 0 : i32
    %c0_i32_0 = arith.constant 0 : i32
    return %arg0, %c0_i32 : i32, i32
  }
}

</mosaic_0001>

<bundles_post_ra>
// kernel: base_snn_loss.2
= control target key start
LH: loop header
LB: loop body
LE: loop exit
PB: predicated region body
PF: predicated region fallthrough
CT: control target
= control target key end

     0   :  { %s532_s6 = smov 0   ;;  %s661_s0 = inlined_call_operand.vmem [shape: f32[384,128], index: 0, kind: input, shape index: {}]   ;;  %s662_s1 = inlined_call_operand.vmem [shape: bf16[384,128], index: 1, kind: output, shape index: {}]  }
   0x1 LB: > { %s384_s7 = sadd.s32 4294967295, %s520_s6   ;;  %p388_p0 = scmp.ge.s32.totalorder %s520_s6, 1  ;;  %s520_s6 = sphi %s532_s6, %s11_s6  }
   0x2   : > { %p88_p1 = scmp.lt.s32.totalorder %s520_s6, 4 }
   0x4   : > { %p89_p2 = pnand %p388_p0, %p88_p1 }
   0x5   : > { %s389_s8 = sshll.u32 (!%p89_p2), %s384_s7, 4 }
   0x6   : > { %92 = sbr.rel (%p89_p2) target bundleno = 207 (0xcf), region = 24  ;;  %p109_p3 = scmp.lt.s32.totalorder (!%p89_p2), %s389_s8, 47 }
   0xb   : > { %s664_s8 = smov (!%p109_p3, %s389_s8), 47 }
   0xc   : > { %s390_s9 = sshll.u32 %s664_s8, 3  ;;  %s392_s13 = sshll.u32 %s664_s8, 2 }
   0xd   : > { %s546_s12 = scalar_lea.vmem %s661_s0, %s390_s9  ;;  %s635_s16 = scalar_lea.vmem %s662_s1, %s392_s13 }
   0xe   : > { %v549_v0 = vld [vmem:[%s546_s12 + $0x10] sm:$0xff]  ;;  %v552_v1 = vld [vmem:[%s546_s12] sm:$0xff]  ;;  %v555_v2 = vld [vmem:[%s546_s12 + $0x18] sm:$0xff] }
   0xf   : > { %v138_v3 = vmul.f32 %v549_v0, %v549_v0  ;;  %v136_v4 = vmul.f32 %v552_v1, %v552_v1  ;;  %v562_v5 = vld [vmem:[%s546_s12 + $0x8] sm:$0xff]  ;;  %v139_v6 = vmul.f32 %v555_v2, %v555_v2  ;;  %v572_v9 = vld [vmem:[%s546_s12 + $0x20] sm:$0xff]  ;;  %v579_v12 = vld [vmem:[%s546_s12 + $0x38] sm:$0xff] }
  0x10   : > { %v137_v7 = vmul.f32 %v562_v5, %v562_v5  ;;  %v569_v8 = vld [vmem:[%s546_s12 + $0x28] sm:$0xff]  ;;  %v140_v11 = vmul.f32 %v572_v9, %v572_v9  ;;  %v582_v13 = vld [vmem:[%s546_s12 + $0x30] sm:$0xff]  ;;  %v143_v14 = vmul.f32 %v579_v12, %v579_v12  ;;  %v592_v17 = vld [vmem:[%s546_s12 + $0x40] sm:$0xff] }
  0x11   : > { %156 = vadd.xlane.f32.xlu1 %v138_v3  ;;  %152 = vadd.xlane.f32.xlu0 %v136_v4  ;;  %v141_v10 = vmul.f32 %v569_v8, %v569_v8  ;;  %v142_v15 = vmul.f32 %v582_v13, %v582_v13  ;;  %v589_v16 = vld [vmem:[%s546_s12 + $0x48] sm:$0xff]  ;;  %v144_v19 = vmul.f32 %v592_v17, %v592_v17  ;;  %v599_v20 = vld [vmem:[%s546_s12 + $0x58] sm:$0xff]  ;;  %v602_v21 = vld [vmem:[%s546_s12 + $0x50] sm:$0xff] }
  0x12   : > { %v145_v18 = vmul.f32 %v589_v16, %v589_v16  ;;  %v147_v22 = vmul.f32 %v599_v20, %v599_v20  ;;  %v146_v23 = vmul.f32 %v602_v21, %v602_v21  ;;  %v609_v24 = vld [vmem:[%s546_s12 + $0x68] sm:$0xff]  ;;  %v612_v25 = vld [vmem:[%s546_s12 + $0x60] sm:$0xff]  ;;  %v619_v28 = vld [vmem:[%s546_s12 + $0x78] sm:$0xff] }
  0x13   : > { %v149_v26 = vmul.f32 %v609_v24, %v609_v24  ;;  %v148_v27 = vmul.f32 %v612_v25, %v612_v25  ;;  %v622_v29 = vld [vmem:[%s546_s12 + $0x70] sm:$0xff]  ;;  %v151_v30 = vmul.f32 %v619_v28, %v619_v28 }
  0x14   : > { %v150_v31 = vmul.f32 %v622_v29, %v622_v29 }
  0x15   : > { %158 = vadd.xlane.f32.xlu1 %v139_v6  ;;  %154 = vadd.xlane.f32.xlu0 %v137_v7 }
  0x19   : > { %162 = vadd.xlane.f32.xlu1 %v141_v10  ;;  %160 = vadd.xlane.f32.xlu0 %v140_v11 }
  0x1d   : > { %166 = vadd.xlane.f32.xlu1 %v143_v14  ;;  %164 = vadd.xlane.f32.xlu0 %v142_v15 }
  0x21   : > { %170 = vadd.xlane.f32.xlu1 %v145_v18  ;;  %168 = vadd.xlane.f32.xlu0 %v144_v19 }
  0x25   : > { %174 = vadd.xlane.f32.xlu1 %v147_v22  ;;  %172 = vadd.xlane.f32.xlu0 %v146_v23 }
  0x29   : > { %178 = vadd.xlane.f32.xlu1 %v149_v26  ;;  %176 = vadd.xlane.f32.xlu0 %v148_v27 }
  0x2d   : > { %182 = vadd.xlane.f32.xlu1 %v151_v30  ;;  %180 = vadd.xlane.f32.xlu0 %v150_v31 }
  0x9a   : > { %v157_v32 = vpop.xlane.xlu1 %156  ;;  %v153_v33 = vpop.xlane.xlu0 %152 }
  0x9b   : > { %v186_v34 = vmax.f32 %v157_v32, 1e-24  ;;  %v184_v35 = vmax.f32 %v153_v33, 1e-24 }
  0x9d   : > { %482 = vrsqrt.f32 %v186_v34 }
  0x9e   : > { %484 = vrsqrt.f32 %v184_v35  ;;  %v159_v36 = vpop.xlane.xlu1 %158  ;;  %v155_v37 = vpop.xlane.xlu0 %154 }
  0x9f   : > { %v187_v38 = vmax.f32 %v159_v36, 1e-24  ;;  %v185_v39 = vmax.f32 %v155_v37, 1e-24 }
  0xa1   : > { %486 = vrsqrt.f32 %v187_v38 }
  0xa2   : > { %488 = vrsqrt.f32 %v185_v39  ;;  %v163_v40 = vpop.xlane.xlu1 %162  ;;  %v161_v41 = vpop.xlane.xlu0 %160 }
  0xa3   : > { %v189_v42 = vmax.f32 %v163_v40, 1e-24  ;;  %v188_v43 = vmax.f32 %v161_v41, 1e-24 }
  0xa5   : > { %490 = vrsqrt.f32 %v189_v42 }
  0xa6   : > { %492 = vrsqrt.f32 %v188_v43  ;;  %v167_v44 = vpop.xlane.xlu1 %166  ;;  %v165_v45 = vpop.xlane.xlu0 %164 }
  0xa7   : > { %v191_v46 = vmax.f32 %v167_v44, 1e-24  ;;  %v190_v47 = vmax.f32 %v165_v45, 1e-24 }
  0xa9   : > { %494 = vrsqrt.f32 %v191_v46 }
  0xaa   : > { %v483_v48 = vpop.eup %482  ;;  %496 = vrsqrt.f32 %v190_v47  ;;  %v171_v49 = vpop.xlane.xlu1 %170 }
  0xab   : > { %v169_v50 = vpop.xlane.xlu0 %168  ;;  %v485_v51 = vpop.eup %484  ;;  %v193_v52 = vmax.f32 %v171_v49, 1e-24  ;;  %v218_v54 = vmul.f32 0.14142136, %v483_v48 }
  0xac   : > { %v192_v53 = vmax.f32 %v169_v50, 1e-24  ;;  %v216_v56 = vmul.f32 0.14142136, %v485_v51 }
  0xad   : > { %498 = vrsqrt.f32 %v193_v52  ;;  %v234_v3 = vmul.f32 %v218_v54, %v549_v0 }
  0xae   : > { %v487_v55 = vpop.eup %486  ;;  %500 = vrsqrt.f32 %v192_v53  ;;  %v175_v57 = vpop.xlane.xlu1 %174  ;;  %v232_v7 = vmul.f32 %v216_v56, %v552_v1 }
  0xaf   : > { %v173_v58 = vpop.xlane.xlu0 %172  ;;  %v489_v59 = vpop.eup %488  ;;  %v219_v60 = vmul.f32 0.14142136, %v487_v55  ;;  %v195_v61 = vmax.f32 %v175_v57, 1e-24 }
  0xb0   : > { %v194_v62 = vmax.f32 %v173_v58, 1e-24  ;;  %v217_v63 = vmul.f32 0.14142136, %v489_v59 }
  0xb1   : > { %v235_v4 = vmul.f32 %v219_v60, %v555_v2  ;;  %502 = vrsqrt.f32 %v195_v61 }
  0xb2   : > { %v491_v6 = vpop.eup %490  ;;  %v233_v10 = vmul.f32 %v217_v63, %v562_v5  ;;  %504 = vrsqrt.f32 %v194_v62  ;;  %v179_v11 = vpop.xlane.xlu1 %178 }
  0xb3   : > { %v177_v14 = vpop.xlane.xlu0 %176  ;;  %v493_v15 = vpop.eup %492  ;;  %v435_v0 = vpack.c.bf16 %v235_v4, %v234_v3  ;;  %v221_v18 = vmul.f32 0.14142136, %v491_v6  ;;  %v197_v2 = vmax.f32 %v179_v11, 1e-24 }
  0xb4   : > { %v196_v19 = vmax.f32 %v177_v14, 1e-24  ;;  %v430_v22 = vpack.c.bf16 %v233_v10, %v232_v7  ;;  %v220_v23 = vmul.f32 0.14142136, %v493_v15 }
  0xb5   : > { %467 = vst [vmem:[%s635_s16 + $0x8] sm:$0xff] %v435_v0   ;;  %v237_v1 = vmul.f32 %v221_v18, %v569_v8  ;;  %506 = vrsqrt.f32 %v197_v2 }
  0xb6   : > { %v495_v26 = vpop.eup %494  ;;  %431 = vst [vmem:[%s635_s16] sm:$0xff] %v430_v22   ;;  %v236_v27 = vmul.f32 %v220_v23, %v572_v9  ;;  %508 = vrsqrt.f32 %v196_v19  ;;  %v183_v5 = vpop.xlane.xlu1 %182 }
  0xb7   : > { %v181_v30 = vpop.xlane.xlu0 %180  ;;  %v497_v31 = vpop.eup %496  ;;  %v223_v32 = vmul.f32 0.14142136, %v495_v26  ;;  %v199_v33 = vmax.f32 %v183_v5, 1e-24 }
  0xb8   : > { %v198_v34 = vmax.f32 %v181_v30, 1e-24  ;;  %v440_v35 = vpack.c.bf16 %v237_v1, %v236_v27  ;;  %v222_v36 = vmul.f32 0.14142136, %v497_v31 }
  0xb9   : > { %v239_v37 = vmul.f32 %v223_v32, %v579_v12  ;;  %510 = vrsqrt.f32 %v199_v33 }
  0xba   : > { %v499_v8 = vpop.eup %498  ;;  %468 = vst [vmem:[%s635_s16 + $0x10] sm:$0xff] %v440_v35   ;;  %v238_v38 = vmul.f32 %v222_v36, %v582_v13  ;;  %512 = vrsqrt.f32 %v198_v34 }
  0xbb   : > { %v501_v9 = vpop.eup %500  ;;  %v225_v39 = vmul.f32 0.14142136, %v499_v8 }
  0xbc   : > { %v445_v40 = vpack.c.bf16 %v239_v37, %v238_v38  ;;  %v224_v41 = vmul.f32 0.14142136, %v501_v9 }
  0xbd   : > { %v241_v42 = vmul.f32 %v225_v39, %v589_v16 }
  0xbe   : > { %v503_v43 = vpop.eup %502  ;;  %469 = vst [vmem:[%s635_s16 + $0x18] sm:$0xff] %v445_v40   ;;  %v240_v44 = vmul.f32 %v224_v41, %v592_v17 }
  0xbf   : > { %v505_v45 = vpop.eup %504  ;;  %v227_v12 = vmul.f32 0.14142136, %v503_v43 }
  0xc0   : > { %v450_v46 = vpack.c.bf16 %v241_v42, %v240_v44  ;;  %v226_v47 = vmul.f32 0.14142136, %v505_v45 }
  0xc1   : > { %v243_v48 = vmul.f32 %v227_v12, %v599_v20 }
  0xc2   : > { %v507_v13 = vpop.eup %506  ;;  %470 = vst [vmem:[%s635_s16 + $0x20] sm:$0xff] %v450_v46   ;;  %v242_v49 = vmul.f32 %v226_v47, %v602_v21 }
  0xc3   : > { %v509_v50 = vpop.eup %508  ;;  %v229_v51 = vmul.f32 0.14142136, %v507_v13 }
  0xc4   : > { %v455_v16 = vpack.c.bf16 %v243_v48, %v242_v49  ;;  %v228_v52 = vmul.f32 0.14142136, %v509_v50 }
  0xc5   : > { %v245_v53 = vmul.f32 %v229_v51, %v609_v24 }
  0xc6   : > { %v511_v54 = vpop.eup %510  ;;  %471 = vst [vmem:[%s635_s16 + $0x28] sm:$0xff] %v455_v16   ;;  %v244_v17 = vmul.f32 %v228_v52, %v612_v25 }
  0xc7   : > { %v513_v55 = vpop.eup %512  ;;  %v231_v56 = vmul.f32 0.14142136, %v511_v54 }
  0xc8   : > { %v460_v57 = vpack.c.bf16 %v245_v53, %v244_v17  ;;  %v230_v20 = vmul.f32 0.14142136, %v513_v55 }
  0xc9   : > { %v247_v58 = vmul.f32 %v231_v56, %v619_v28 }
  0xca   : > { %472 = vst [vmem:[%s635_s16 + $0x30] sm:$0xff] %v460_v57   ;;  %v246_v21 = vmul.f32 %v230_v20, %v622_v29 }
  0xcc   : > { %v465_v59 = vpack.c.bf16 %v247_v58, %v246_v21 }
  0xce   : > { %473 = vst [vmem:[%s635_s16 + $0x38] sm:$0xff] %v465_v59  }
  0xcf PF: > { %s11_s6 = sadd.s32 1, %s520_s6  }
  0xd0   : > { %p8_p4 = scmp.ge.s32.totalorder %s11_s6, 5  }
  0xd2   :  { %10 = sbr.rel (!%p8_p4) target bundleno = 1 (0x1), region = 54 }

// kernel: base_snn_loss.3
= control target key start
LH: loop header
LB: loop body
LE: loop exit
PB: predicated region body
PF: predicated region fallthrough
CT: control target
= control target key end

     0   :  { %s1422_s18 = smov 0   ;;  %s1424_s19 = smov 0   ;;  %s1898_s0 = inlined_call_operand.vmem [shape: s32[384,1], index: 0, kind: input, shape index: {}]   ;;  %s1899_s1 = inlined_call_operand.vmem [shape: s32[1,384], index: 1, kind: input, shape index: {}]   ;;  %s1900_s2 = inlined_call_operand.vmem [shape: bf16[384,128], index: 2, kind: input, shape index: {}, may-alias: {2,3}]   ;;  %s1901_s3 = inlined_call_operand.vmem [shape: bf16[384,128], index: 3, kind: input, shape index: {}, may-alias: {2,3}]   ;;  %s1902_s4 = inlined_call_operand.vmem [shape: f32[384,1], index: 4, kind: output, shape index: {0}]   ;;  %s1903_s5 = inlined_call_operand.vmem [shape: f32[384,1], index: 5, kind: output, shape index: {1}]  }
   0x1   :  { %s1426_s20 = smov 0   ;;  %s1428_s21 = smov 0  }
   0x2   :  { %s1430_s22 = smov 0  }
   0x3 LB: > { %s25_s23 = sadd.s32 1, %s1381_s20  ;;  %s28_s24 = sadd.s32 1, %s1385_s21  ;;  %s1389_s22 = sphi %s1430_s22, %s16_s22   ;;  %s1385_s21 = sphi %s1428_s21, %s1907_s21   ;;  %s1381_s20 = sphi %s1426_s20, %s1906_s20   ;;  %s1377_s19 = sphi %s1424_s19, %s1905_s19   ;;  %s1373_s18 = sphi %s1422_s18, %s1904_s18  }
   0x4   : > { %p26_p0 = scmp.ge.s32.totalorder %s25_s23, 3  ;;  %p1124_p1 = scmp.ge.s32.totalorder %s1389_s22, 1 }
   0x5   : > { %p233_p2 = scmp.lt.s32.totalorder %s1389_s22, 10 }
   0x6   : > { %s1909_s23 = smov (%p26_p0, %s25_s23), 0  ;;  %s1911_s24 = smov (!%p26_p0, %s28_s24), %s1385_s21 }
   0x7   : > { %p234_p3 = pnand %p1124_p1, %p233_p2  ;;  %p30_p4 = scmp.ge.s32.totalorder %s1911_s24, 3 }
   0x8   : > { %s1129_s25 = sshll.u32 (!%p234_p3), %s1373_s18, 4  ;;  %s1125_s26 = sshll.u32 (!%p234_p3), %s1377_s19, 4 }
   0x9   : > { %s1913_s24 = smov (%p30_p4, %s1911_s24), 0  ;;  %237 = sbr.rel (%p234_p3) target bundleno = 709 (0x2c5), region = 36 }
   0xa   : > { %p295_p5 = scmp.lt.s32.totalorder (!%p234_p3), %s1129_s25, 47  ;;  %p280_p6 = scmp.lt.s32.totalorder (!%p234_p3), %s1125_s26, 47 }
   0xb   : > { %p285_p7 = scmp.lt.s32.totalorder (!%p234_p3), %s1373_s18, 2  ;;  %p1152_p8 = scmp.ne.s32.totalorder (!%p234_p3), %s1373_s18, 0 }
   0xe   : > { %v1391_v0 = vmov 0   ;;  %s1915_s25 = smov (!%p295_p5, %s1129_s25), 47  ;;  %s1917_s26 = smov (!%p280_p6, %s1125_s26), 47 }
   0xf   : > { %1261 = vset.pattern.permute.xlu0 %v1391_v0  ;;  %1262 = vset.pattern.permute.xlu1 %v1391_v0  ;;  %s1130_s27 = sshll.u32 %s1915_s25, 2  ;;  %s1126_s6 = sshll.u32 %s1917_s26, 3 }
  0x10   : > { %s1458_s30 = scalar_lea.vmem %s1901_s3, %s1130_s27  ;;  %s1465_s9 = scalar_lea.vmem %s1902_s4, %s1126_s6 }
  0x11   : > { %v1263_v1 = vld [vmem:[%s1458_s30 + $0x38] sm:$0xff]   ;;  %v1264_v2 = vld [vmem:[%s1458_s30 + $0x30] sm:$0xff]   ;;  %s1128_s10 = sshll.u32 %s1917_s26, 2  ;;  %s1470_s13 = scalar_lea.vmem %s1903_s5, %s1126_s6  ;;  %v1265_v3 = vld [vmem:[%s1458_s30 + $0x28] sm:$0xff]  }
  0x12   : > { %1172 = vmatprep.subr.bf16.mxu0 %v1263_v1  ;;  %1204 = vmatprep.subr.bf16.mxu1 %v1263_v1  ;;  %s1475_s16 = scalar_lea.vmem %s1900_s2, %s1128_s10  ;;  %s1487_s25 = scalar_lea.vmem %s1898_s0, %s1126_s6  ;;  %v1266_v10 = vld [vmem:[%s1458_s30 + $0x20] sm:$0xff]   ;;  %v1267_v15 = vld [vmem:[%s1458_s30 + $0x18] sm:$0xff]   ;;  %v1268_v20 = vld [vmem:[%s1458_s30 + $0x10] sm:$0xff]  }
  0x13   : > { %1173 = vmatpush3.bf16.xpose.msra.mxu0 %v1263_v1  ;;  %1212 = vmatpush3.bf16.xpose.msra.mxu1 %v1263_v1  ;;  %v1479_v4 = vld [vmem:[%s1475_s16] sm:$0xff]   ;;  %v572_v7 = vld [vmem:[%s1487_s25 + $0x10] sm:$0xff]  ;;  %v571_v8 = vld [vmem:[%s1487_s25 + $0x8] sm:$0xff]  ;;  %s286_s26 = scalar_select %p285_p7, %s1373_s18, 2 }
  0x14   : > { %1174 = vmatprep.subr.bf16.mxu0 %v1264_v2  ;;  %1205 = vmatprep.subr.bf16.mxu1 %v1264_v2  ;;  %v1482_v5 = vld [vmem:[%s1475_s16 + $0x20] sm:$0xff]   ;;  %v573_v9 = vld [vmem:[%s1487_s25 + $0x18] sm:$0xff]  ;;  %v575_v12 = vld [vmem:[%s1487_s25 + $0x28] sm:$0xff] }
  0x15   : > { %v570_v6 = vld [vmem:[%s1487_s25] sm:$0xff]  ;;  %1188 = vmatprep.mubr.bf16.mxu0 %v1479_v4  ;;  %1196 = vmatprep.mubr.bf16.mxu1 %v1482_v5  ;;  %v576_v13 = vld [vmem:[%s1487_s25 + $0x30] sm:$0xff]  ;;  %v577_v14 = vld [vmem:[%s1487_s25 + $0x38] sm:$0xff]  ;;  %s287_s29 = scalar_lea.vmem %s1899_s1, %s286_s26 }
  0x16   : > { %588 = vperm.xlu0 %1261, %v570_v6   ;;  %594 = vperm.xlu1 %1262, %v572_v7   ;;  %v574_v11 = vld [vmem:[%s1487_s25 + $0x20] sm:$0xff]  ;;  %v579_v17 = vld [vmem:[%s1487_s25 + $0x48] sm:$0xff]  ;;  %v580_v18 = vld [vmem:[%s1487_s25 + $0x50] sm:$0xff] }
  0x17   : > { %v578_v16 = vld [vmem:[%s1487_s25 + $0x40] sm:$0xff]  ;;  %v581_v19 = vld [vmem:[%s1487_s25 + $0x58] sm:$0xff]  ;;  %v583_v22 = vld [vmem:[%s1487_s25 + $0x68] sm:$0xff] }
  0x18   : > { %v582_v21 = vld [vmem:[%s1487_s25 + $0x60] sm:$0xff]  ;;  %v584_v23 = vld [vmem:[%s1487_s25 + $0x70] sm:$0xff]  ;;  %v585_v24 = vld [vmem:[%s1487_s25 + $0x78] sm:$0xff] }
  0x19   : > { %v1269_v25 = vld [vmem:[%s1458_s30 + $0x8] sm:$0xff]   ;;  %v1270_v26 = vld [vmem:[%s1458_s30] sm:$0xff]   ;;  %v1519_v29 = vld [vmem:[%s1475_s16 + $0x10] sm:$0xff]  }
  0x1a   : > { %591 = vperm.xlu0 %1261, %v571_v8   ;;  %597 = vperm.xlu1 %1262, %v573_v9   ;;  %v1513_v27 = vld [vmem:[%s1475_s16 + $0x8] sm:$0xff]   ;;  %v1522_v30 = vld [vmem:[%s1475_s16 + $0x30] sm:$0xff]   ;;  %v1529_v31 = vld [vmem:[%s1475_s16 + $0x18] sm:$0xff]  }
  0x1b   : > { %1175 = vmatpush3.bf16.xpose.msra.mxu0 %v1264_v2  ;;  %1213 = vmatpush3.bf16.xpose.msra.mxu1 %v1264_v2  ;;  %v1516_v28 = vld [vmem:[%s1475_s16 + $0x28] sm:$0xff]   ;;  %v1532_v32 = vld [vmem:[%s1475_s16 + $0x38] sm:$0xff]   ;;  %v1551_v54 = vld [vmem:[%s287_s29] ss:$0 sm:$0xff] }
  0x1c   : > { %1176 = vmatprep.subr.bf16.mxu0 %v1265_v3  ;;  %1206 = vmatprep.subr.bf16.mxu1 %v1265_v3 }
  0x1e   : > { %600 = vperm.xlu0 %1261, %v574_v11   ;;  %603 = vperm.xlu1 %1262, %v575_v12  }
  0x22   : > { %606 = vperm.xlu0 %1261, %v576_v13   ;;  %609 = vperm.xlu1 %1262, %v577_v14  }
  0x23   : > { %1177 = vmatpush3.bf16.xpose.msra.mxu0 %v1265_v3  ;;  %1214 = vmatpush3.bf16.xpose.msra.mxu1 %v1265_v3 }
  0x24   : > { %1178 = vmatprep.subr.bf16.mxu0 %v1266_v10  ;;  %1207 = vmatprep.subr.bf16.mxu1 %v1266_v10 }
  0x26   : > { %612 = vperm.xlu0 %1261, %v578_v16   ;;  %615 = vperm.xlu1 %1262, %v579_v17  }
  0x2a   : > { %618 = vperm.xlu0 %1261, %v580_v18   ;;  %621 = vperm.xlu1 %1262, %v581_v19  }
  0x2b   : > { %1179 = vmatpush3.bf16.xpose.msra.mxu0 %v1266_v10  ;;  %1215 = vmatpush3.bf16.xpose.msra.mxu1 %v1266_v10 }
  0x2c   : > { %1180 = vmatprep.subr.bf16.mxu0 %v1267_v15  ;;  %1208 = vmatprep.subr.bf16.mxu1 %v1267_v15 }
  0x2e   : > { %624 = vperm.xlu0 %1261, %v582_v21   ;;  %627 = vperm.xlu1 %1262, %v583_v22  }
  0x32   : > { %630 = vperm.xlu0 %1261, %v584_v23   ;;  %633 = vperm.xlu1 %1262, %v585_v24  }
  0x33   : > { %1181 = vmatpush3.bf16.xpose.msra.mxu0 %v1267_v15  ;;  %1216 = vmatpush3.bf16.xpose.msra.mxu1 %v1267_v15 }
  0x34   : > { %1182 = vmatprep.subr.bf16.mxu0 %v1268_v20  ;;  %1209 = vmatprep.subr.bf16.mxu1 %v1268_v20 }
  0x3b   : > { %1183 = vmatpush3.bf16.xpose.msra.mxu0 %v1268_v20  ;;  %1217 = vmatpush3.bf16.xpose.msra.mxu1 %v1268_v20 }
  0x3c   : > { %1184 = vmatprep.subr.bf16.mxu0 %v1269_v25  ;;  %1210 = vmatprep.subr.bf16.mxu1 %v1269_v25 }
  0x43   : > { %1185 = vmatpush3.bf16.xpose.msra.mxu0 %v1269_v25  ;;  %1218 = vmatpush3.bf16.xpose.msra.mxu1 %v1269_v25 }
  0x44   : > { %1186 = vmatprep.subr.bf16.mxu0 %v1270_v26  ;;  %1211 = vmatprep.subr.bf16.mxu1 %v1270_v26 }
  0x4b   : > { %1187 = vmatpush3.bf16.xpose.msra.mxu0 %v1270_v26  ;;  %1219 = vmatpush3.bf16.xpose.msra.mxu1 %v1270_v26 }
  0x52   : > { %1189 = vmatmul.mubr.bf16.vlgmr.msra.gmra.mxu0 %v1513_v27  ;;  %1197 = vmatmul.mubr.bf16.vlgmr.msra.gmra.mxu1 %v1516_v28 }
  0x53   : > { %1192 = vmatprep.mubr.bf16.mxu0 %v1519_v29  ;;  %1200 = vmatprep.mubr.bf16.mxu1 %v1522_v30 }
  0x5a   : > { %1193 = vmatmul.mubr.bf16.gmra.mxu0 %v1529_v31  ;;  %1201 = vmatmul.mubr.bf16.gmra.mxu1 %v1532_v32 }
  0x91   : > { %v1536_v33 = vpop.permute.xlu0 %588  ;;  %v595_v40 = vpop.permute.xlu1 %594 }
  0x92   : > { %vm641_vm0 = vcmp.eq.s32.totalorder %v595_v40, %v1551_v54  ;;  %vm639_vm3 = vcmp.eq.s32.totalorder %v1536_v33, %v1551_v54 }
  0x95   : > { %v1538_v34 = vpop.permute.xlu0 %591  ;;  %v598_v47 = vpop.permute.xlu1 %597 }
  0x96   : > { %vm642_vm2 = vcmp.eq.s32.totalorder %v598_v47, %v1551_v54  ;;  %vm640_vm6 = vcmp.eq.s32.totalorder %v1538_v34, %v1551_v54 }
  0x99   : > { %v1540_v44 = vpop.permute.xlu0 %600  ;;  %v1549_v51 = vpop.permute.xlu1 %603 }
  0x9a   : > { %vm643_vm10 = vcmp.eq.s32.totalorder %v1540_v44, %v1551_v54  ;;  %vm644_vm12 = vcmp.eq.s32.totalorder %v1549_v51, %v1551_v54 }
  0x9d   : > { %v1544_v48 = vpop.permute.xlu0 %606  ;;  %v1554_v59 = vpop.permute.xlu1 %609 }
  0x9e   : > { %vm645_vm8 = vcmp.eq.s32.totalorder %v1544_v48, %v1551_v54  ;;  %vm646_vm9 = vcmp.eq.s32.totalorder %v1554_v59, %v1551_v54 }
  0xa1   : > { %v613_v55 = vpop.permute.xlu0 %612  ;;  %v616_v3 = vpop.permute.xlu1 %615 }
  0xa2   : > { %vm647_vm5 = vcmp.eq.s32.totalorder %v613_v55, %v1551_v54  ;;  %vm648_vm7 = vcmp.eq.s32.totalorder %v616_v3, %v1551_v54 }
  0xa5   : > { %v619_v61 = vpop.permute.xlu0 %618  ;;  %v622_v16 = vpop.permute.xlu1 %621 }
  0xa6   : > { %vm649_vm1 = vcmp.eq.s32.totalorder %v619_v61, %v1551_v54  ;;  %vm650_vm4 = vcmp.eq.s32.totalorder %v622_v16, %v1551_v54 }
  0xa9   : > { %v625_v47 = vpop.permute.xlu0 %624  ;;  %v628_v55 = vpop.permute.xlu1 %627 }
  0xaa   : > { %vm651_vm11 = vcmp.eq.s32.totalorder %v625_v47, %v1551_v54  ;;  %vm652_vm14 = vcmp.eq.s32.totalorder %v628_v55, %v1551_v54 }
  0xad   : > { %v634_v44 = vpop.permute.xlu1 %633 }
  0xae   : > { %vm654_vm15 = vcmp.eq.s32.totalorder %v634_v44, %v1551_v54 }
 0x112   : > { %v1190_v35 = vpop.f32.mrf.mxu0  ;;  %v1198_v36 = vpop.f32.mrf.mxu1 }
 0x113   : > { %v542_v37 = vmul.f32 1.442695, %v1190_v35  ;;  %v558_v38 = vmul.f32 1.442695, %v1198_v36 }
 0x114   : > { %v475_v39 = vpop.f32.mrf.mxu0  ;;  %v507_v42 = vpop.f32.mrf.mxu1 }
 0x115   : > { %1287 = vpow2.f32 %v542_v37  ;;  %v538_v41 = vmul.f32 1.442695, %v475_v39  ;;  %v554_v50 = vmul.f32 1.442695, %v507_v42 }
 0x116   : > { %1289 = vpow2.f32 %v558_v38  ;;  %v1191_v43 = vpop.f32.mrf.mxu0  ;;  %v1199_v46 = vpop.f32.mrf.mxu1 }
 0x117   : > { %1291 = vpow2.f32 %v538_v41  ;;  %v544_v45 = vmul.f32 1.442695, %v1191_v43  ;;  %v560_v49 = vmul.f32 1.442695, %v1199_v46 }
 0x118   : > { %v478_v57 = vpop.f32.mrf.mxu0  ;;  %v510_v58 = vpop.f32.mrf.mxu1 }
 0x119   : > { %1293 = vpow2.f32 %v544_v45  ;;  %v556_v62 = vmul.f32 1.442695, %v510_v58  ;;  %v540_v0 = vmul.f32 1.442695, %v478_v57 }
 0x11a   : > { %1295 = vpow2.f32 %v560_v49  ;;  %v1194_v1 = vpop.f32.mrf.mxu0  ;;  %v1202_v8 = vpop.f32.mrf.mxu1 }
 0x11b   : > { %1297 = vpow2.f32 %v554_v50  ;;  %v550_v7 = vmul.f32 1.442695, %v1194_v1  ;;  %v566_v11 = vmul.f32 1.442695, %v1202_v8 }
 0x11c   : > { %1299 = vpow2.f32 %v556_v62  ;;  %v491_v9 = vpop.f32.mrf.mxu0  ;;  %v523_v12 = vpop.f32.mrf.mxu1 }
 0x11d   : > { %1301 = vpow2.f32 %v540_v0  ;;  %v546_v23 = vmul.f32 1.442695, %v491_v9  ;;  %v562_v25 = vmul.f32 1.442695, %v523_v12 }
 0x11e   : > { %1303 = vpow2.f32 %v550_v7  ;;  %v1195_v13 = vpop.f32.mrf.mxu0  ;;  %v1203_v18 = vpop.f32.mrf.mxu1 }
 0x11f   : > { %v552_v17 = vmul.f32 1.442695, %v1195_v13  ;;  %1305 = vpow2.f32 %v566_v11  ;;  %v568_v21 = vmul.f32 1.442695, %v1203_v18 }
 0x120   : > { %v494_v26 = vpop.f32.mrf.mxu0  ;;  %v526_v37 = vpop.f32.mrf.mxu1 }
 0x121   : > { %1307 = vpow2.f32 %v552_v17  ;;  %v548_v36 = vmul.f32 1.442695, %v494_v26  ;;  %v564_v40 = vmul.f32 1.442695, %v526_v37 }
 0x122   : > { %v1288_v52 = vpop.eup %1287  ;;  %1309 = vpow2.f32 %v568_v21 }
 0x123   : > { %v1290_v53 = vpop.eup %1289  ;;  %659 = vadd.xlane.f32.xlu0 %v1288_v52  ;;  %v689_v60 = vsel %vm641_vm0, %v1288_v52, 0.0  ;;  %1311 = vpow2.f32 %v546_v23  ;;  %v631_v52 = vpop.permute.xlu0 %630 }
 0x124   : > { %675 = vadd.xlane.f32.xlu1 %v1290_v53  ;;  %v1292_v56 = vpop.eup %1291  ;;  %v697_v2 = vsel %vm649_vm1, %v1290_v53, 0.0  ;;  %1313 = vpow2.f32 %v562_v25  ;;  %vm653_vm13 = vcmp.eq.s32.totalorder %v631_v52, %v1551_v54 }
 0x125   : > { %v687_v15 = vsel %vm639_vm3, %v1292_v56, 0.0  ;;  %1315 = vpow2.f32 %v548_v36 }
 0x126   : > { %v1294_v63 = vpop.eup %1293  ;;  %1317 = vpow2.f32 %v564_v40 }
 0x127   : > { %655 = vadd.xlane.f32.xlu0 %v1292_v56  ;;  %v1296_v6 = vpop.eup %1295  ;;  %v690_v14 = vsel %vm642_vm2, %v1294_v63, 0.0 }
 0x128   : > { %707 = vadd.xlane.f32.xlu1 %v689_v60  ;;  %v1298_v10 = vpop.eup %1297  ;;  %v698_v19 = vsel %vm650_vm4, %v1296_v6, 0.0 }
 0x129   : > { %v695_v20 = vsel %vm647_vm5, %v1298_v10, 0.0  ;;  %v1300_v22 = vpop.eup %1299 }
 0x12a   : > { %v1302_v24 = vpop.eup %1301  ;;  %v696_v38 = vsel %vm648_vm7, %v1300_v22, 0.0 }
 0x12b   : > { %661 = vadd.xlane.f32.xlu0 %v1294_v63  ;;  %v688_v33 = vsel %vm640_vm6, %v1302_v24, 0.0  ;;  %v1304_v35 = vpop.eup %1303 }
 0x12c   : > { %723 = vadd.xlane.f32.xlu1 %v697_v2  ;;  %v1306_v39 = vpop.eup %1305  ;;  %v693_v41 = vsel %vm645_vm8, %v1304_v35, 0.0 }
 0x12d   : > { %v701_v57 = vsel %vm653_vm13, %v1306_v39, 0.0 }
 0x12e   : > { %v1308_v34 = vpop.eup %1307 }
 0x12f   : > { %677 = vadd.xlane.f32.xlu0 %v1296_v6  ;;  %v1310_v42 = vpop.eup %1309  ;;  %v694_v45 = vsel %vm646_vm9, %v1308_v34, 0.0 }
 0x130   : > { %671 = vadd.xlane.f32.xlu1 %v1298_v10  ;;  %v1312_v43 = vpop.eup %1311  ;;  %v702_v59 = vsel %vm654_vm15, %v1310_v42, 0.0 }
 0x131   : > { %v1314_v46 = vpop.eup %1313  ;;  %v691_v48 = vsel %vm643_vm10, %v1312_v43, 0.0 }
 0x132   : > { %v1316_v49 = vpop.eup %1315  ;;  %v699_v53 = vsel %vm651_vm11, %v1314_v46, 0.0 }
 0x133   : > { %709 = vadd.xlane.f32.xlu0 %v690_v14  ;;  %v1318_v50 = vpop.eup %1317  ;;  %v692_v56 = vsel %vm644_vm12, %v1316_v49, 0.0 }
 0x134   : > { %703 = vadd.xlane.f32.xlu1 %v687_v15  ;;  %v700_v58 = vsel %vm652_vm14, %v1318_v50, 0.0 }
 0x137   : > { %725 = vadd.xlane.f32.xlu0 %v698_v19 }
 0x138   : > { %719 = vadd.xlane.f32.xlu1 %v695_v20 }
 0x13b   : > { %673 = vadd.xlane.f32.xlu0 %v1300_v22 }
 0x13c   : > { %657 = vadd.xlane.f32.xlu1 %v1302_v24 }
 0x13f   : > { %705 = vadd.xlane.f32.xlu0 %v688_v33 }
 0x140   : > { %667 = vadd.xlane.f32.xlu1 %v1304_v35 }
 0x143   : > { %721 = vadd.xlane.f32.xlu0 %v696_v38 }
 0x144   : > { %683 = vadd.xlane.f32.xlu1 %v1306_v39 }
 0x147   : > { %669 = vadd.xlane.f32.xlu0 %v1308_v34 }
 0x148   : > { %715 = vadd.xlane.f32.xlu1 %v693_v41 }
 0x14b   : > { %685 = vadd.xlane.f32.xlu0 %v1310_v42 }
 0x14c   : > { %663 = vadd.xlane.f32.xlu1 %v1312_v43 }
 0x14f   : > { %717 = vadd.xlane.f32.xlu0 %v694_v45 }
 0x150   : > { %679 = vadd.xlane.f32.xlu1 %v1314_v46 }
 0x153   : > { %665 = vadd.xlane.f32.xlu0 %v1316_v49 }
 0x154   : > { %711 = vadd.xlane.f32.xlu1 %v691_v48 }
 0x157   : > { %681 = vadd.xlane.f32.xlu0 %v1318_v50 }
 0x158   : > { %727 = vadd.xlane.f32.xlu1 %v699_v53 }
 0x15b   : > { %713 = vadd.xlane.f32.xlu0 %v692_v56 }
 0x15c   : > { %731 = vadd.xlane.f32.xlu1 %v701_v57 }
 0x15f   : > { %729 = vadd.xlane.f32.xlu0 %v700_v58 }
 0x163   : > { %733 = vadd.xlane.f32.xlu0 %v702_v59 }
 0x1ac   : > { %v1577_v60 = vpop.xlane.xlu0 %659 }
 0x1ad   : > { %v1579_v61 = vpop.xlane.xlu1 %675 }
 0x1b0   : > { %v1581_v51 = vpop.xlane.xlu0 %655 }
 0x1b1   : > { %v1583_v62 = vpop.xlane.xlu1 %707 }
 0x1b4   : > { %v1585_v63 = vpop.xlane.xlu0 %661 }
 0x1b5   : > { %v1587_v0 = vpop.xlane.xlu1 %723 }
 0x1b8   : > { %v1589_v1 = vpop.xlane.xlu0 %677 }
 0x1b9   : > { %v1591_v2 = vpop.xlane.xlu1 %671 }
 0x1bc   : > { %v1593_v3 = vpop.xlane.xlu0 %709 }
 0x1bd   : > { %v1595_v54 = vpop.xlane.xlu1 %703 }
 0x1c0   : > { %v1597_v6 = vpop.xlane.xlu0 %725 }
 0x1c1   : > { %v1599_v7 = vpop.xlane.xlu1 %719 }
 0x1c4   : > { %v1601_v8 = vpop.xlane.xlu0 %673 }
 0x1c5   : > { %v1603_v9 = vpop.xlane.xlu1 %657 }
 0x1c8   : > { %v1605_v10 = vpop.xlane.xlu0 %705 }
 0x1c9   : > { %v1607_v11 = vpop.xlane.xlu1 %667 }
 0x1cc   : > { %v1609_v12 = vpop.xlane.xlu0 %721 }
 0x1cd   : > { %v1611_v13 = vpop.xlane.xlu1 %683 }
 0x1d0   : > { %v1613_v14 = vpop.xlane.xlu0 %669 }
 0x1d1   : > { %v1615_v15 = vpop.xlane.xlu1 %715 }
 0x1d4   : > { %v1617_v16 = vpop.xlane.xlu0 %685 }
 0x1d5   : > { %v1619_v17 = vpop.xlane.xlu1 %663 }
 0x1d8   : > { %v1621_v18 = vpop.xlane.xlu0 %717 }
 0x1d9   : > { %v1623_v19 = vpop.xlane.xlu1 %679 }
 0x1dc   : > { %v1625_v20 = vpop.xlane.xlu0 %665 }
 0x1dd   : > { %v1627_v21 = vpop.xlane.xlu1 %711 }
 0x1e0   : > { %v1629_v22 = vpop.xlane.xlu0 %681 }
 0x1e1   : > { %v1631_v23 = vpop.xlane.xlu1 %727 }
 0x1e4   : > { %v1633_v24 = vpop.xlane.xlu0 %713 }
 0x1e5   : > { %v1635_v25 = vpop.xlane.xlu1 %731 }
 0x1e8   : > { %v1637_v26 = vpop.xlane.xlu0 %729  ;;  %738 = sbr.rel (%p1152_p8) target bundleno = 683 (0x2ab), region = 40 }
 0x1ec   : > { %v1639_v33 = vpop.xlane.xlu0 %733 }
 0x1ed   : > { %v741_v35 = vunpack.c.l.bf16 %v1513_v27  ;;  %v739_v36 = vunpack.c.l.bf16 %v1479_v4  ;;  %v742_v37 = vunpack.c.h.bf16 %v1513_v27  ;;  %v740_v38 = vunpack.c.h.bf16 %v1479_v4 }
 0x1ee   : > { %v744_v42 = vunpack.c.h.bf16 %v1519_v29  ;;  %v743_v27 = vunpack.c.l.bf16 %v1519_v29  ;;  %v746_v4 = vunpack.c.h.bf16 %v1529_v31  ;;  %v745_v46 = vunpack.c.l.bf16 %v1529_v31 }
 0x1ef   : > { %v757_v39 = vmul.f32 %v741_v35, %v741_v35  ;;  %v755_v40 = vmul.f32 %v739_v36, %v739_v36  ;;  %v758_v34 = vmul.f32 %v742_v37, %v742_v37  ;;  %v756_v41 = vmul.f32 %v740_v38, %v740_v38 }
 0x1f0   : > { %v760_v43 = vmul.f32 %v744_v42, %v744_v42  ;;  %v759_v45 = vmul.f32 %v743_v27, %v743_v27  ;;  %vm835_vm0 = vcmask 7168   ;;  %v762_v29 = vmul.f32 %v746_v4, %v746_v4 }
 0x1f1   : > { %775 = vadd.xlane.f32.xlu1 %v757_v39  ;;  %771 = vadd.xlane.f32.xlu0 %v755_v40  ;;  %836 = vst.msk [vmem:[%s1465_s9] sm:$0xff] %vm835_vm0, %v1581_v51  ;;  %837 = vst.msk [vmem:[%s1465_s9 + $0x8] sm:$0xff] %vm835_vm0, %v1603_v9  ;;  %v761_v31 = vmul.f32 %v745_v46, %v745_v46  ;;  %v748_v47 = vunpack.c.h.bf16 %v1482_v5  ;;  %v747_v49 = vunpack.c.l.bf16 %v1482_v5  ;;  %v750_v52 = vunpack.c.h.bf16 %v1516_v28 }
 0x1f2   : > { %838 = vst.msk [vmem:[%s1465_s9 + $0x10] sm:$0xff] %vm835_vm0, %v1577_v60  ;;  %839 = vst.msk [vmem:[%s1465_s9 + $0x18] sm:$0xff] %vm835_vm0, %v1585_v63  ;;  %v749_v53 = vunpack.c.l.bf16 %v1516_v28  ;;  %v752_v57 = vunpack.c.h.bf16 %v1522_v30  ;;  %v751_v44 = vunpack.c.l.bf16 %v1522_v30  ;;  %v754_v59 = vunpack.c.h.bf16 %v1532_v32 }
 0x1f3   : > { %840 = vst.msk [vmem:[%s1465_s9 + $0x20] sm:$0xff] %vm835_vm0, %v1619_v17  ;;  %841 = vst.msk [vmem:[%s1465_s9 + $0x28] sm:$0xff] %vm835_vm0, %v1625_v20  ;;  %v764_v48 = vmul.f32 %v748_v47, %v748_v47  ;;  %v763_v50 = vmul.f32 %v747_v49, %v747_v49  ;;  %v766_v55 = vmul.f32 %v750_v52, %v750_v52  ;;  %v753_v35 = vunpack.c.l.bf16 %v1532_v32 }
 0x1f4   : > { %842 = vst.msk [vmem:[%s1465_s9 + $0x30] sm:$0xff] %vm835_vm0, %v1607_v11  ;;  %843 = vst.msk [vmem:[%s1465_s9 + $0x38] sm:$0xff] %vm835_vm0, %v1613_v14  ;;  %v765_v56 = vmul.f32 %v749_v53, %v749_v53  ;;  %v768_v58 = vmul.f32 %v752_v57, %v752_v57  ;;  %v767_v5 = vmul.f32 %v751_v44, %v751_v44 }
 0x1f5   : > { %777 = vadd.xlane.f32.xlu1 %v758_v34  ;;  %773 = vadd.xlane.f32.xlu0 %v756_v41  ;;  %844 = vst.msk [vmem:[%s1465_s9 + $0x40] sm:$0xff] %vm835_vm0, %v1591_v2  ;;  %845 = vst.msk [vmem:[%s1465_s9 + $0x48] sm:$0xff] %vm835_vm0, %v1601_v8  ;;  %v770_v36 = vmul.f32 %v754_v59, %v754_v59  ;;  %v769_v28 = vmul.f32 %v753_v35, %v753_v35 }
 0x1f6   : > { %846 = vst.msk [vmem:[%s1465_s9 + $0x50] sm:$0xff] %vm835_vm0, %v1579_v61  ;;  %847 = vst.msk [vmem:[%s1465_s9 + $0x58] sm:$0xff] %vm835_vm0, %v1589_v1 }
 0x1f7   : > { %848 = vst.msk [vmem:[%s1465_s9 + $0x60] sm:$0xff] %vm835_vm0, %v1623_v19  ;;  %849 = vst.msk [vmem:[%s1465_s9 + $0x68] sm:$0xff] %vm835_vm0, %v1629_v22 }
 0x1f8   : > { %850 = vst.msk [vmem:[%s1465_s9 + $0x70] sm:$0xff] %vm835_vm0, %v1611_v13  ;;  %851 = vst.msk [vmem:[%s1465_s9 + $0x78] sm:$0xff] %vm835_vm0, %v1617_v16 }
 0x1f9   : > { %781 = vadd.xlane.f32.xlu1 %v760_v43  ;;  %779 = vadd.xlane.f32.xlu0 %v759_v45 }
 0x1fd   : > { %785 = vadd.xlane.f32.xlu1 %v762_v29  ;;  %783 = vadd.xlane.f32.xlu0 %v761_v31 }
 0x201   : > { %789 = vadd.xlane.f32.xlu1 %v764_v48  ;;  %787 = vadd.xlane.f32.xlu0 %v763_v50 }
 0x205   : > { %793 = vadd.xlane.f32.xlu1 %v766_v55  ;;  %791 = vadd.xlane.f32.xlu0 %v765_v56 }
 0x209   : > { %797 = vadd.xlane.f32.xlu1 %v768_v58  ;;  %795 = vadd.xlane.f32.xlu0 %v767_v5 }
 0x20d   : > { %801 = vadd.xlane.f32.xlu1 %v770_v36  ;;  %799 = vadd.xlane.f32.xlu0 %v769_v28 }
 0x27a   : > { %v776_v37 = vpop.xlane.xlu1 %775  ;;  %v772_v38 = vpop.xlane.xlu0 %771 }
 0x27b   : > { %v807_v39 = vmul.f32 1.442695, %v776_v37  ;;  %v803_v40 = vmul.f32 1.442695, %v772_v38 }
 0x27d   : > { %1319 = vpow2.f32 %v807_v39 }
 0x27e   : > { %1321 = vpow2.f32 %v803_v40  ;;  %v778_v30 = vpop.xlane.xlu1 %777  ;;  %v774_v34 = vpop.xlane.xlu0 %773 }
 0x27f   : > { %v809_v41 = vmul.f32 1.442695, %v778_v30  ;;  %v805_v42 = vmul.f32 1.442695, %v774_v34 }
 0x281   : > { %1323 = vpow2.f32 %v809_v41 }
 0x282   : > { %1325 = vpow2.f32 %v805_v42  ;;  %v782_v27 = vpop.xlane.xlu1 %781  ;;  %v780_v32 = vpop.xlane.xlu0 %779 }
 0x283   : > { %v813_v4 = vmul.f32 1.442695, %v782_v27  ;;  %v811_v43 = vmul.f32 1.442695, %v780_v32 }
 0x285   : > { %1327 = vpow2.f32 %v813_v4 }
 0x286   : > { %1329 = vpow2.f32 %v811_v43  ;;  %v786_v45 = vpop.xlane.xlu1 %785  ;;  %v784_v46 = vpop.xlane.xlu0 %783 }
 0x287   : > { %v817_v29 = vmul.f32 1.442695, %v786_v45  ;;  %v815_v31 = vmul.f32 1.442695, %v784_v46 }
 0x289   : > { %1331 = vpow2.f32 %v817_v29 }
 0x28a   : > { %v1320_v47 = vpop.eup %1319  ;;  %1333 = vpow2.f32 %v815_v31  ;;  %v790_v49 = vpop.xlane.xlu1 %789 }
 0x28b   : > { %v788_v48 = vpop.xlane.xlu0 %787  ;;  %v1322_v50 = vpop.eup %1321  ;;  %v854_v52 = vsub.f32 %v1583_v62, %v1320_v47  ;;  %v821_v53 = vmul.f32 1.442695, %v790_v49 }
 0x28c   : > { %v819_v55 = vmul.f32 1.442695, %v788_v48  ;;  %v852_v56 = vsub.f32 %v1595_v54, %v1322_v50 }
 0x28d   : > { %870 = vst.msk [vmem:[%s1470_s13 + $0x10] sm:$0xff] %vm835_vm0, %v854_v52  ;;  %1335 = vpow2.f32 %v821_v53 }
 0x28e   : > { %v1324_v57 = vpop.eup %1323  ;;  %868 = vst.msk [vmem:[%s1470_s13] sm:$0xff] %vm835_vm0, %v852_v56  ;;  %1337 = vpow2.f32 %v819_v55  ;;  %v794_v44 = vpop.xlane.xlu1 %793 }
 0x28f   : > { %v792_v58 = vpop.xlane.xlu0 %791  ;;  %v1326_v5 = vpop.eup %1325  ;;  %v855_v59 = vsub.f32 %v1593_v3, %v1324_v57  ;;  %v825_v35 = vmul.f32 1.442695, %v794_v44 }
 0x290   : > { %v823_v36 = vmul.f32 1.442695, %v792_v58  ;;  %v853_v28 = vsub.f32 %v1605_v10, %v1326_v5 }
 0x291   : > { %871 = vst.msk [vmem:[%s1470_s13 + $0x18] sm:$0xff] %vm835_vm0, %v855_v59  ;;  %1339 = vpow2.f32 %v825_v35 }
 0x292   : > { %v1328_v37 = vpop.eup %1327  ;;  %869 = vst.msk [vmem:[%s1470_s13 + $0x8] sm:$0xff] %vm835_vm0, %v853_v28  ;;  %1341 = vpow2.f32 %v823_v36  ;;  %v798_v38 = vpop.xlane.xlu1 %797 }
 0x293   : > { %v796_v39 = vpop.xlane.xlu0 %795  ;;  %v1330_v40 = vpop.eup %1329  ;;  %v857_v30 = vsub.f32 %v1633_v24, %v1328_v37  ;;  %v829_v34 = vmul.f32 1.442695, %v798_v38 }
 0x294   : > { %v827_v41 = vmul.f32 1.442695, %v796_v39  ;;  %v856_v42 = vsub.f32 %v1627_v21, %v1330_v40 }
 0x295   : > { %873 = vst.msk [vmem:[%s1470_s13 + $0x28] sm:$0xff] %vm835_vm0, %v857_v30  ;;  %1343 = vpow2.f32 %v829_v34 }
 0x296   : > { %v1332_v27 = vpop.eup %1331  ;;  %872 = vst.msk [vmem:[%s1470_s13 + $0x20] sm:$0xff] %vm835_vm0, %v856_v42  ;;  %1345 = vpow2.f32 %v827_v41  ;;  %v802_v32 = vpop.xlane.xlu1 %801 }
 0x297   : > { %v800_v4 = vpop.xlane.xlu0 %799  ;;  %v1334_v43 = vpop.eup %1333  ;;  %v859_v45 = vsub.f32 %v1621_v18, %v1332_v27  ;;  %v833_v46 = vmul.f32 1.442695, %v802_v32 }
 0x298   : > { %v831_v29 = vmul.f32 1.442695, %v800_v4  ;;  %v858_v31 = vsub.f32 %v1615_v15, %v1334_v43 }
 0x299   : > { %875 = vst.msk [vmem:[%s1470_s13 + $0x38] sm:$0xff] %vm835_vm0, %v859_v45  ;;  %1347 = vpow2.f32 %v833_v46 }
 0x29a   : > { %v1336_v47 = vpop.eup %1335  ;;  %874 = vst.msk [vmem:[%s1470_s13 + $0x30] sm:$0xff] %vm835_vm0, %v858_v31  ;;  %1349 = vpow2.f32 %v831_v29 }
 0x29b   : > { %v1338_v49 = vpop.eup %1337  ;;  %v861_v48 = vsub.f32 %v1609_v12, %v1336_v47 }
 0x29c   : > { %v860_v50 = vsub.f32 %v1599_v7, %v1338_v49 }
 0x29d   : > { %877 = vst.msk [vmem:[%s1470_s13 + $0x48] sm:$0xff] %vm835_vm0, %v861_v48 }
 0x29e   : > { %v1340_v52 = vpop.eup %1339  ;;  %876 = vst.msk [vmem:[%s1470_s13 + $0x40] sm:$0xff] %vm835_vm0, %v860_v50 }
 0x29f   : > { %v1342_v53 = vpop.eup %1341  ;;  %v863_v55 = vsub.f32 %v1597_v6, %v1340_v52 }
 0x2a0   : > { %v862_v56 = vsub.f32 %v1587_v0, %v1342_v53 }
 0x2a1   : > { %879 = vst.msk [vmem:[%s1470_s13 + $0x58] sm:$0xff] %vm835_vm0, %v863_v55 }
 0x2a2   : > { %v1344_v57 = vpop.eup %1343  ;;  %878 = vst.msk [vmem:[%s1470_s13 + $0x50] sm:$0xff] %vm835_vm0, %v862_v56 }
 0x2a3   : > { %v1346_v44 = vpop.eup %1345  ;;  %v865_v58 = vsub.f32 %v1637_v26, %v1344_v57 }
 0x2a4   : > { %v864_v5 = vsub.f32 %v1631_v23, %v1346_v44 }
 0x2a5   : > { %881 = vst.msk [vmem:[%s1470_s13 + $0x68] sm:$0xff] %vm835_vm0, %v865_v58 }
 0x2a6   : > { %v1348_v59 = vpop.eup %1347  ;;  %880 = vst.msk [vmem:[%s1470_s13 + $0x60] sm:$0xff] %vm835_vm0, %v864_v5 }
 0x2a7   : > { %v1350_v35 = vpop.eup %1349  ;;  %v867_v36 = vsub.f32 %v1639_v33, %v1348_v59 }
 0x2a8   : > { %v866_v28 = vsub.f32 %v1635_v25, %v1350_v35 }
 0x2a9   : > { %883 = vst.msk [vmem:[%s1470_s13 + $0x78] sm:$0xff] %vm835_vm0, %v867_v36 }
 0x2aa   : > { %882 = vst.msk [vmem:[%s1470_s13 + $0x70] sm:$0xff] %vm835_vm0, %v866_v28 }
 0x2ab PF: > { %p1153_p9 = scmp.le.s32.totalorder %s1373_s18, 0 }
 0x2ad   : > { %887 = sbr.rel (%p1153_p9) target bundleno = 709 (0x2c5), region = 44 }
 0x2b2   : > { %v888_v37 = vld [vmem:[%s1465_s9] sm:$0xff]  ;;  %vm920_vm1 = vcmask 7168   ;;  %v889_v38 = vld [vmem:[%s1465_s9 + $0x8] sm:$0xff]  ;;  %v890_v39 = vld [vmem:[%s1465_s9 + $0x10] sm:$0xff] }
 0x2b3   : > { %v904_v40 = vadd.f32 %v888_v37, %v1581_v51  ;;  %v905_v30 = vadd.f32 %v889_v38, %v1603_v9  ;;  %v906_v34 = vadd.f32 %v890_v39, %v1577_v60  ;;  %v891_v41 = vld [vmem:[%s1465_s9 + $0x18] sm:$0xff]  ;;  %v892_v42 = vld [vmem:[%s1465_s9 + $0x20] sm:$0xff]  ;;  %v893_v27 = vld [vmem:[%s1465_s9 + $0x28] sm:$0xff] }
 0x2b4   : > { %v907_v32 = vadd.f32 %v891_v41, %v1585_v63  ;;  %v908_v4 = vadd.f32 %v892_v42, %v1619_v17  ;;  %v909_v43 = vadd.f32 %v893_v27, %v1625_v20  ;;  %v894_v51 = vld [vmem:[%s1465_s9 + $0x30] sm:$0xff]  ;;  %v895_v45 = vld [vmem:[%s1465_s9 + $0x38] sm:$0xff]  ;;  %v896_v9 = vld [vmem:[%s1465_s9 + $0x40] sm:$0xff] }
 0x2b5   : > { %921 = vst.msk [vmem:[%s1465_s9] sm:$0xff] %vm920_vm1, %v904_v40  ;;  %922 = vst.msk [vmem:[%s1465_s9 + $0x8] sm:$0xff] %vm920_vm1, %v905_v30  ;;  %v910_v60 = vadd.f32 %v894_v51, %v1607_v11  ;;  %v911_v63 = vadd.f32 %v895_v45, %v1613_v14  ;;  %v912_v17 = vadd.f32 %v896_v9, %v1591_v2  ;;  %v897_v20 = vld [vmem:[%s1465_s9 + $0x48] sm:$0xff]  ;;  %v898_v46 = vld [vmem:[%s1465_s9 + $0x50] sm:$0xff] }
 0x2b6   : > { %923 = vst.msk [vmem:[%s1465_s9 + $0x10] sm:$0xff] %vm920_vm1, %v906_v34  ;;  %v899_v29 = vld [vmem:[%s1465_s9 + $0x58] sm:$0xff]  ;;  %924 = vst.msk [vmem:[%s1465_s9 + $0x18] sm:$0xff] %vm920_vm1, %v907_v32  ;;  %v913_v11 = vadd.f32 %v897_v20, %v1601_v8  ;;  %v914_v14 = vadd.f32 %v898_v46, %v1579_v61  ;;  %v900_v31 = vld [vmem:[%s1465_s9 + $0x60] sm:$0xff] }
 0x2b7   : > { %925 = vst.msk [vmem:[%s1465_s9 + $0x20] sm:$0xff] %vm920_vm1, %v908_v4  ;;  %926 = vst.msk [vmem:[%s1465_s9 + $0x28] sm:$0xff] %vm920_vm1, %v909_v43  ;;  %v915_v2 = vadd.f32 %v899_v29, %v1589_v1  ;;  %v901_v47 = vld [vmem:[%s1465_s9 + $0x68] sm:$0xff]  ;;  %v902_v49 = vld [vmem:[%s1465_s9 + $0x70] sm:$0xff]  ;;  %v916_v8 = vadd.f32 %v900_v31, %v1623_v19 }
 0x2b8   : > { %927 = vst.msk [vmem:[%s1465_s9 + $0x30] sm:$0xff] %vm920_vm1, %v910_v60  ;;  %928 = vst.msk [vmem:[%s1465_s9 + $0x38] sm:$0xff] %vm920_vm1, %v911_v63  ;;  %v917_v61 = vadd.f32 %v901_v47, %v1629_v22  ;;  %v918_v1 = vadd.f32 %v902_v49, %v1611_v13  ;;  %v903_v48 = vld [vmem:[%s1465_s9 + $0x78] sm:$0xff]  ;;  %v937_v50 = vld [vmem:[%s1470_s13] sm:$0xff] }
 0x2b9   : > { %929 = vst.msk [vmem:[%s1465_s9 + $0x40] sm:$0xff] %vm920_vm1, %v912_v17  ;;  %v938_v52 = vld [vmem:[%s1470_s13 + $0x8] sm:$0xff]  ;;  %930 = vst.msk [vmem:[%s1465_s9 + $0x48] sm:$0xff] %vm920_vm1, %v913_v11  ;;  %v919_v19 = vadd.f32 %v903_v48, %v1617_v16  ;;  %v953_v22 = vadd.f32 %v937_v50, %v1595_v54  ;;  %v939_v53 = vld [vmem:[%s1470_s13 + $0x10] sm:$0xff] }
 0x2ba   : > { %931 = vst.msk [vmem:[%s1465_s9 + $0x50] sm:$0xff] %vm920_vm1, %v914_v14  ;;  %932 = vst.msk [vmem:[%s1465_s9 + $0x58] sm:$0xff] %vm920_vm1, %v915_v2  ;;  %v954_v13 = vadd.f32 %v938_v52, %v1605_v10  ;;  %v940_v55 = vld [vmem:[%s1470_s13 + $0x18] sm:$0xff]  ;;  %v941_v56 = vld [vmem:[%s1470_s13 + $0x20] sm:$0xff]  ;;  %v955_v16 = vadd.f32 %v939_v53, %v1583_v62 }
 0x2bb   : > { %933 = vst.msk [vmem:[%s1465_s9 + $0x60] sm:$0xff] %vm920_vm1, %v916_v8  ;;  %934 = vst.msk [vmem:[%s1465_s9 + $0x68] sm:$0xff] %vm920_vm1, %v917_v61  ;;  %v956_v54 = vadd.f32 %v940_v55, %v1593_v3  ;;  %v957_v10 = vadd.f32 %v941_v56, %v1627_v21  ;;  %v942_v57 = vld [vmem:[%s1470_s13 + $0x28] sm:$0xff]  ;;  %v943_v44 = vld [vmem:[%s1470_s13 + $0x30] sm:$0xff] }
 0x2bc   : > { %935 = vst.msk [vmem:[%s1465_s9 + $0x70] sm:$0xff] %vm920_vm1, %v918_v1  ;;  %v944_v58 = vld [vmem:[%s1470_s13 + $0x38] sm:$0xff]  ;;  %936 = vst.msk [vmem:[%s1465_s9 + $0x78] sm:$0xff] %vm920_vm1, %v919_v19  ;;  %v958_v62 = vadd.f32 %v942_v57, %v1633_v24  ;;  %v959_v3 = vadd.f32 %v943_v44, %v1615_v15  ;;  %v945_v5 = vld [vmem:[%s1470_s13 + $0x40] sm:$0xff] }
 0x2bd   : > { %969 = vst.msk [vmem:[%s1470_s13] sm:$0xff] %vm920_vm1, %v953_v22  ;;  %970 = vst.msk [vmem:[%s1470_s13 + $0x8] sm:$0xff] %vm920_vm1, %v954_v13  ;;  %v960_v21 = vadd.f32 %v944_v58, %v1621_v18  ;;  %v946_v59 = vld [vmem:[%s1470_s13 + $0x48] sm:$0xff]  ;;  %v947_v35 = vld [vmem:[%s1470_s13 + $0x50] sm:$0xff]  ;;  %v961_v24 = vadd.f32 %v945_v5, %v1599_v7 }
 0x2be   : > { %971 = vst.msk [vmem:[%s1470_s13 + $0x10] sm:$0xff] %vm920_vm1, %v955_v16  ;;  %972 = vst.msk [vmem:[%s1470_s13 + $0x18] sm:$0xff] %vm920_vm1, %v956_v54  ;;  %v962_v15 = vadd.f32 %v946_v59, %v1609_v12  ;;  %v963_v18 = vadd.f32 %v947_v35, %v1587_v0  ;;  %v948_v36 = vld [vmem:[%s1470_s13 + $0x58] sm:$0xff]  ;;  %v949_v28 = vld [vmem:[%s1470_s13 + $0x60] sm:$0xff] }
 0x2bf   : > { %973 = vst.msk [vmem:[%s1470_s13 + $0x20] sm:$0xff] %vm920_vm1, %v957_v10  ;;  %v950_v37 = vld [vmem:[%s1470_s13 + $0x68] sm:$0xff]  ;;  %974 = vst.msk [vmem:[%s1470_s13 + $0x28] sm:$0xff] %vm920_vm1, %v958_v62  ;;  %v964_v7 = vadd.f32 %v948_v36, %v1597_v6  ;;  %v965_v12 = vadd.f32 %v949_v28, %v1631_v23  ;;  %v951_v38 = vld [vmem:[%s1470_s13 + $0x70] sm:$0xff] }
 0x2c0   : > { %975 = vst.msk [vmem:[%s1470_s13 + $0x30] sm:$0xff] %vm920_vm1, %v959_v3  ;;  %976 = vst.msk [vmem:[%s1470_s13 + $0x38] sm:$0xff] %vm920_vm1, %v960_v21  ;;  %v966_v0 = vadd.f32 %v950_v37, %v1637_v26  ;;  %v952_v39 = vld [vmem:[%s1470_s13 + $0x78] sm:$0xff]  ;;  %v967_v40 = vadd.f32 %v951_v38, %v1635_v25 }
 0x2c1   : > { %977 = vst.msk [vmem:[%s1470_s13 + $0x40] sm:$0xff] %vm920_vm1, %v961_v24  ;;  %978 = vst.msk [vmem:[%s1470_s13 + $0x48] sm:$0xff] %vm920_vm1, %v962_v15  ;;  %v968_v30 = vadd.f32 %v952_v39, %v1639_v33 }
 0x2c2   : > { %979 = vst.msk [vmem:[%s1470_s13 + $0x50] sm:$0xff] %vm920_vm1, %v963_v18  ;;  %980 = vst.msk [vmem:[%s1470_s13 + $0x58] sm:$0xff] %vm920_vm1, %v964_v7 }
 0x2c3   : > { %981 = vst.msk [vmem:[%s1470_s13 + $0x60] sm:$0xff] %vm920_vm1, %v965_v12  ;;  %982 = vst.msk [vmem:[%s1470_s13 + $0x68] sm:$0xff] %vm920_vm1, %v966_v0 }
 0x2c4   : > { %983 = vst.msk [vmem:[%s1470_s13 + $0x70] sm:$0xff] %vm920_vm1, %v967_v40  ;;  %984 = vst.msk [vmem:[%s1470_s13 + $0x78] sm:$0xff] %vm920_vm1, %v968_v30 }
 0x2c5 PF: > { %s16_s22 = sadd.s32 1, %s1389_s22   ;;  %s1904_s18 = smov %s1381_s20 }
 0x2c6   : > { %p13_p10 = scmp.ge.s32.totalorder %s16_s22, 11   ;;  %s1905_s19 = smov %s1385_s21 }
 0x2c7   : > { %s1906_s20 = smov %s1909_s23  ;;  %s1907_s21 = smov %s1913_s24 }
 0x2c8   :  { %15 = sbr.rel (!%p13_p10) target bundleno = 3 (0x3), region = 95 }

</bundles_post_ra>
